<compile_context>
chip_gen: v5e
topology: v5e:2x2
jax: 0.10.0
libtpu: 0.0.40
codegen_flags: <defaults>
</compile_context>

<pallas_src>
import jax
import jax.numpy as jnp
from jax.experimental import pallas as pl
from jax.experimental.pallas import tpu as pltpu


def _round_up(v, m):
    return (v + m - 1) // m * m


def classifier_kernel(x_ref, w_ref, b_ref, o_ref):
    # x arrives in encoder-native f32; cast to bf16 on the VPU (the kernel is
    # HBM-bound so the cast is free) and run the folded matmul on the MXU
    # with f32 accumulation.
    x = x_ref[...].astype(w_ref.dtype)
    logits = jnp.dot(x, w_ref[...],
                     preferred_element_type=jnp.float32) + b_ref[...]
    # log_softmax over the lane-dense (128-wide) class dim.  Padded class
    # columns carry a -1e30 bias, so they never win the max and their exp()
    # underflows to exactly 0 -> excluded from the normalizer.
    m = jnp.max(logits, axis=-1, keepdims=True)
    s = logits - m
    lse = jnp.log(jnp.sum(jnp.exp(s), axis=-1, keepdims=True))
    o_ref[...] = (s - lse).astype(o_ref.dtype)


def prepare_classifier_params(w1, b1, w2, b2):
    """One-time (hoisted) weight prep: fold fc1 into fc2 and pad lane-dense.

    w1: (dim_in, rep_dim); b1: (1, rep_dim); w2: (rep_dim, num_classes);
    b2: (1, num_classes).
    Returns (w_p, b_p, num_classes):
      w_p: (dim_in, nc_p) bf16 folded weight, nc_p = round_up(num_classes,128)
      b_p: (1, nc_p) f32 folded bias; padded columns = -1e30.
    """
    num_classes = w2.shape[1]
    dim_in = w1.shape[0]
    nc_p = _round_up(num_classes, 128)

    w1f = w1.astype(jnp.float32)
    w2f = w2.astype(jnp.float32)
    w_fold = w1f @ w2f                                               # (dim_in, nc)
    b_fold = b1.astype(jnp.float32) @ w2f + b2.astype(jnp.float32)   # (1, nc)

    w_p = jnp.zeros((dim_in, nc_p), jnp.bfloat16)
    w_p = w_p.at[:, :num_classes].set(w_fold.astype(jnp.bfloat16))
    b_p = jnp.full((1, nc_p), -1e30, jnp.float32)
    b_p = b_p.at[:, :num_classes].set(b_fold)
    return w_p, b_p, num_classes


_VMEM_BUDGET = 40 * 1024 * 1024   # leaves headroom inside v7x's 64 MiB VMEM


def _choose_tb(batch, dim_in, nc_p, tb_max):
    # Per-step VMEM: double-buffered x (f32) + double-buffered out (f32)
    # + epilogue temporaries; fixed: double-buffered folded weight + bias.
    bytes_per_row = 2 * dim_in * 4 + 2 * nc_p * 4 + 4 * nc_p * 4
    fixed = 2 * dim_in * nc_p * 2 + 2 * nc_p * 4
    tb_fit = max(8, ((_VMEM_BUDGET - fixed) // bytes_per_row) // 8 * 8)
    # Cap at ceil(B/2) so the "parallel" batch axis gives >=2 grid steps
    # whenever possible (megacore sharding on v7x).
    tb_half = _round_up(max(1, (batch + 1) // 2), 8)
    return max(8, min(_round_up(tb_max, 8), tb_fit, tb_half))


def classifier_forward(x_nchw, w_p, b_p, num_classes, *, tb=1024,
                       out_dtype=jnp.float32):
    """x_nchw: (B, C, H, W).  w_p/b_p from prepare_classifier_params.
    Returns log-probabilities of shape (B, num_classes)."""
    B = x_nchw.shape[0]
    dim_in = x_nchw.shape[1] * x_nchw.shape[2] * x_nchw.shape[3]
    nc_p = w_p.shape[1]

    # encoder stand-in: flatten (contiguous reshape -> view, no HBM copy).
    # TODO(synk): the real backbone `model_fun` is external to the module; a
    # flatten stand-in is used so dim_in = C*H*W.
    x_feat = x_nchw.reshape(B, dim_in)

    TB = _choose_tb(B, dim_in, nc_p, tb)
    grid = (pl.cdiv(B, TB),)

    est_vmem = (2 * TB * dim_in * 4 + 2 * TB * nc_p * 4 + 4 * TB * nc_p * 4
                + 2 * dim_in * nc_p * 2 + 2 * nc_p * 4)
    vmem_limit = min(max(est_vmem + 8 * 1024 * 1024, 32 * 1024 * 1024),
                     56 * 1024 * 1024)

    cost = pl.CostEstimate(
        flops=2 * B * dim_in * nc_p,
        transcendentals=B * nc_p,
        bytes_accessed=(B * dim_in * 4 + dim_in * nc_p * 2 + nc_p * 4
                        + B * nc_p * 4),
    )

    out = pl.pallas_call(
        classifier_kernel,
        out_shape=jax.ShapeDtypeStruct((B, nc_p), out_dtype),
        grid=grid,
        in_specs=[
            pl.BlockSpec((TB, dim_in), lambda i: (i, 0)),    # streamed x tiles
            pl.BlockSpec((dim_in, nc_p), lambda i: (0, 0)),  # resident folded W
            pl.BlockSpec((1, nc_p), lambda i: (0, 0)),       # resident bias
        ],
        out_specs=pl.BlockSpec((TB, nc_p), lambda i: (i, 0)),
        compiler_params=pltpu.CompilerParams(
            dimension_semantics=("parallel",),               # megacore on v7x
            vmem_limit_bytes=vmem_limit,
        ),
        cost_estimate=cost,
    )(x_feat, w_p, b_p)

    # Drop the padded class columns.  (Consumers able to take the padded
    # (B, 128) block directly can skip this slice and save ~10% HBM traffic.)
    return out[:, :num_classes]


def reference_forward_matched(x_nchw, w1, b1, w2, b2):
    """Reference mirroring the kernel numerics: folded weights, bf16 MXU
    inputs, f32 accumulation, f32 log_softmax."""
    B = x_nchw.shape[0]
    x = x_nchw.reshape(B, -1).astype(jnp.bfloat16)
    w2f = w2.astype(jnp.float32)
    w = (w1.astype(jnp.float32) @ w2f).astype(jnp.bfloat16)
    b = b1.astype(jnp.float32) @ w2f + b2.astype(jnp.float32)
    logits = jnp.dot(x, w, preferred_element_type=jnp.float32) + b
    return jax.nn.log_softmax(logits, axis=1)


def reference_forward_f32(x_nchw, w1, b1, w2, b2):
    """Pure-f32 PyTorch-equivalent math (unfolded fc1 -> fc2 -> log_softmax)."""
    B = x_nchw.shape[0]
    x = x_nchw.reshape(B, -1).astype(jnp.float32)
    h = x @ w1 + b1
    logits = h @ w2 + b2
    return jax.nn.log_softmax(logits, axis=1)


if __name__ == "__main__":
    # Small shapes consistent with the forward:
    #   x: (2, 4, 16, 16)  -> dim_in = 4*16*16 = 1024
    #   rep_dim = 32, num_classes = 10
    B, C, H, W = 2, 4, 16, 16
    dim_in = C * H * W
    rep_dim = 32
    num_classes = 10

    key = jax.random.PRNGKey(0)
    kx, kw1, kb1, kw2, kb2 = jax.random.split(key, 5)

    x = jax.random.normal(kx, (B, C, H, W), dtype=jnp.float32)
    # "Linear" parameters stored pre-transposed: (in, out)
    w1 = jax.random.normal(kw1, (dim_in, rep_dim), dtype=jnp.float32) * 0.02
    b1 = jax.random.normal(kb1, (1, rep_dim), dtype=jnp.float32) * 0.02
    w2 = jax.random.normal(kw2, (rep_dim, num_classes), dtype=jnp.float32) * 0.02
    b2 = jax.random.normal(kb2, (1, num_classes), dtype=jnp.float32) * 0.02

    # Hoisted one-time weight prep (fold fc1 into fc2, pad lane-dense).
    w_p, b_p, nc = prepare_classifier_params(w1, b1, w2, b2)

    out = classifier_forward(x, w_p, b_p, nc)
    out = jax.block_until_ready(out)
    assert out.shape == (B, num_classes)
    assert bool(jnp.all(jnp.isfinite(out))), "non-finite log-probs"

    # Tight check against a reference with matched (folded, bf16-in / f32-acc)
    # numerics.
    ref_m = reference_forward_matched(x, w1, b1, w2, b2)
    assert jnp.allclose(out, ref_m, atol=1e-3, rtol=1e-3), "mismatch vs matched ref"

    # Loose sanity check against the pure-f32, unfolded PyTorch-equivalent math.
    ref_f = reference_forward_f32(x, w1, b1, w2, b2)
    assert jnp.allclose(out, ref_f, atol=3e-2, rtol=3e-2), "mismatch vs f32 ref"

    print("KERNEL_OK")
</pallas_src>

<mosaic_0001>
module attributes {stable_mosaic.version = 11 : i64} {
  func.func @classifier_kernel(%arg0: i32, %arg1: memref<8x1024xf32, #tpu.memory_space<vmem>>, %arg2: memref<1024x128xbf16, #tpu.memory_space<vmem>>, %arg3: memref<1x128xf32, #tpu.memory_space<vmem>>, %arg4: memref<8x128xf32, #tpu.memory_space<vmem>>) attributes {dimension_semantics = [#tpu.dimension_semantics<parallel>], iteration_bounds = array<i64: 1>, scalar_prefetch = 0 : i64, scratch_operands = 0 : i64, tpu.core_type = #tpu.core_type<tc>, window_params = [{transform_indices = @transform_0, window_bounds = array<i64: 8, 1024>}, {pipeline_mode = #tpu.pipeline_mode<synchronous>, transform_indices = @transform_1, window_bounds = array<i64: 1024, 128>}, {pipeline_mode = #tpu.pipeline_mode<synchronous>, transform_indices = @transform_2, window_bounds = array<i64: 1, 128>}, {transform_indices = @transform_3, window_bounds = array<i64: 8, 128>}]} {
    %c0 = arith.constant 0 : index
    %c0_0 = arith.constant 0 : index
    %0 = vector.load %arg1[%c0, %c0_0] : memref<8x1024xf32, #tpu.memory_space<vmem>>, vector<8x1024xf32>
    %1 = arith.truncf %0 : vector<8x1024xf32> to vector<8x1024xbf16>
    %c0_1 = arith.constant 0 : index
    %c0_2 = arith.constant 0 : index
    %2 = vector.load %arg2[%c0_1, %c0_2] : memref<1024x128xbf16, #tpu.memory_space<vmem>>, vector<1024x128xbf16>
    %cst = arith.constant dense<0.000000e+00> : vector<8x128xf32>
    %3 = tpu.matmul %1, %2, %cst {dimension_numbers = #tpu.dot_dimension_numbers<[1], [0], [0], [1], [0, 0, 1, 1], [], []>} : vector<8x1024xbf16>, vector<1024x128xbf16>, vector<8x128xf32> -> vector<8x128xf32>
    %c0_3 = arith.constant 0 : index
    %c0_4 = arith.constant 0 : index
    %4 = vector.load %arg3[%c0_3, %c0_4] : memref<1x128xf32, #tpu.memory_space<vmem>>, vector<1x128xf32>
    %5 = vector.broadcast %4 : vector<1x128xf32> to vector<8x128xf32>
    %6 = arith.addf %3, %5 : vector<8x128xf32>
    %cst_5 = arith.constant dense<0xFF800000> : vector<8xf32>
    %7 = vector.multi_reduction <maximumf>, %6, %cst_5 [1] : vector<8x128xf32> to vector<8xf32>
    %8 = vector.shape_cast %7 : vector<8xf32> to vector<8x1xf32>
    %9 = vector.broadcast %8 : vector<8x1xf32> to vector<8x128xf32>
    %10 = arith.subf %6, %9 : vector<8x128xf32>
    %11 = math.exp %10 : vector<8x128xf32>
    %cst_6 = arith.constant dense<0.000000e+00> : vector<8xf32>
    %12 = vector.multi_reduction <add>, %11, %cst_6 [1] : vector<8x128xf32> to vector<8xf32>
    %13 = vector.shape_cast %12 : vector<8xf32> to vector<8x1xf32>
    %14 = math.log %13 : vector<8x1xf32>
    %15 = vector.broadcast %14 : vector<8x1xf32> to vector<8x128xf32>
    %16 = arith.subf %10, %15 : vector<8x128xf32>
    %c0_7 = arith.constant 0 : index
    %c0_8 = arith.constant 0 : index
    %17 = vector.load %arg4[%c0_7, %c0_8] : memref<8x128xf32, #tpu.memory_space<vmem>>, vector<8x128xf32>
    tpu.vector_store %arg4[%c0_7, %c0_8], %16 {strides = array<i32>} : memref<8x128xf32, #tpu.memory_space<vmem>>, vector<8x128xf32>,
    return
  }
  func.func @transform_0(%arg0: i32) -> (i32, i32) {
    %c0_i32 = arith.constant 0 : i32
    %c0_i32_0 = arith.constant 0 : i32
    return %arg0, %c0_i32 : i32, i32
  }
  func.func @transform_1(%arg0: i32) -> (i32, i32) {
    %c0_i32 = arith.constant 0 : i32
    %c0_i32_0 = arith.constant 0 : i32
    %c0_i32_1 = arith.constant 0 : i32
    return %c0_i32, %c0_i32_0 : i32, i32
  }
  func.func @transform_2(%arg0: i32) -> (i32, i32) {
    %c0_i32 = arith.constant 0 : i32
    %c0_i32_0 = arith.constant 0 : i32
    %c0_i32_1 = arith.constant 0 : i32
    return %c0_i32, %c0_i32_0 : i32, i32
  }
  func.func @transform_3(%arg0: i32) -> (i32, i32) {
    %c0_i32 = arith.constant 0 : i32
    %c0_i32_0 = arith.constant 0 : i32
    return %arg0, %c0_i32 : i32, i32
  }
}

</mosaic_0001>

<bundles_post_ra>
// kernel: tpu_custom_call.1
= control target key start
LH: loop header
LB: loop body
LE: loop exit
PB: predicated region body
PF: predicated region fallthrough
CT: control target
= control target key end

     0   :  { %8 = vsyncpa [#allocation3], 0  ;;  %s1206_s0 = inlined_call_operand.hbm [shape: f32[2,1024], index: 0, kind: input, shape index: {}]   ;;  %s1207_s1 = inlined_call_operand.hbm [shape: bf16[1024,128], index: 1, kind: input, shape index: {}]   ;;  %s1208_s2 = inlined_call_operand.vmem [shape: f32[1,128], index: 2, kind: input, shape index: {}]   ;;  %s1209_s3 = inlined_call_operand.hbm [shape: f32[2,128], index: 3, kind: output, shape index: {}]  }
   0x1   :  { %9 = vsyncpa [#allocation6], 0 }
   0x2   :  { %10 = vsyncpa [#allocation4], 0 }
   0x3   :  { %14 = vsyncadd [#allocation3], 768  ;;  %s15_s14 = sshll.u32 %s1206_s0, 4  ;;  %s1165_s15 = smov [#allocation2]   ;;  %s16_s14 = int_to_ptr.hbm [resolvable:$true] %s15_s14 }
   0x4   :  { %s17_s16 = sshll.u32 %s1165_s15, 4  ;;  %s28_s19 = sshll.u32 %s1207_s1, 4  ;;  %s18_s16 = int_to_ptr.vmem [resolvable:$true] %s17_s16  ;;  %s29_s19 = int_to_ptr.hbm [resolvable:$true] %s28_s19 }
   0x5   :  { %s1166_s20 = smov 256   ;;  %s1167_s21 = smov 16  }
   0x6   :  { %23 = dma.hbm_to_vmem [thread:$0]  %s16_s14, 256, %s18_s16, [#allocation3], %s1166_s20, %s1166_s20, %s1167_s21  }
   0x7   :  { %s1168_s22 = smov [#allocation5]   ;;  %s1169_s24 = smov 64  }
   0x8   :  { %s30_s23 = sshll.u32 %s1168_s22, 4  ;;  %s1170_s25 = smov 4   ;;  %s31_s23 = int_to_ptr.vmem [resolvable:$true] %s30_s23 }
   0x9   :  { %36 = dma.hbm_to_vmem [thread:$0]  %s29_s19, 8192, %s31_s23, [#allocation6], %s1169_s24, %s1169_s24, %s1170_s25  }
   0xa   :  { %1159 = dma.done.wait [#allocation3], 1024  }
   0xb   :  { %1160 = vsyncadd [#allocation3], 4294966272 }
   0xc   :  { %1161 = dma.done.wait [#allocation6], 8192  }
   0xd   :  { %1162 = vsyncadd [#allocation6], 4294959104  ;;  %v1016_v0 = vld [vmem:[#allocation5 + $0x38] sm:$0xff]  ;;  %v1015_v4 = vld [vmem:[#allocation5 + $0x30] sm:$0xff] }
   0xe   :  { %v1024_v1 = vld [vmem:[#allocation5 + $0x78] sm:$0xff]  ;;  %618 = vmatpush.bf16.msra.mxu0 %v1016_v0  ;;  %v1023_v5 = vld [vmem:[#allocation5 + $0x70] sm:$0xff]  ;;  %v1014_v8 = vld [vmem:[#allocation5 + $0x28] sm:$0xff] }
   0xf   :  { %v1032_v2 = vld [vmem:[#allocation5 + $0xb8] sm:$0xff]  ;;  %631 = vmatpush.bf16.msra.mxu1 %v1024_v1  ;;  %v1031_v6 = vld [vmem:[#allocation5 + $0xb0] sm:$0xff]  ;;  %v1022_v9 = vld [vmem:[#allocation5 + $0x68] sm:$0xff] }
  0x10   :  { %v1040_v3 = vld [vmem:[#allocation5 + $0xf8] sm:$0xff]  ;;  %644 = vmatpush.bf16.msra.mxu2 %v1032_v2  ;;  %v1039_v7 = vld [vmem:[#allocation5 + $0xf0] sm:$0xff]  ;;  %v1030_v10 = vld [vmem:[#allocation5 + $0xa8] sm:$0xff] }
  0x11   :  { %657 = vmatpush.bf16.msra.mxu3 %v1040_v3  ;;  %v1038_v11 = vld [vmem:[#allocation5 + $0xe8] sm:$0xff]  ;;  %v1013_v12 = vld [vmem:[#allocation5 + $0x20] sm:$0xff]  ;;  %v1012_v16 = vld [vmem:[#allocation5 + $0x18] sm:$0xff] }
  0x12   :  { %619 = vmatpush.bf16.msra.mxu0 %v1015_v4  ;;  %v1021_v13 = vld [vmem:[#allocation5 + $0x60] sm:$0xff]  ;;  %v49_v18 = vld [vmem:[#allocation2 + $0x10] sm:$0xff]  ;;  %v1020_v19 = vld [vmem:[#allocation5 + $0x58] sm:$0xff] }
  0x13   :  { %632 = vmatpush.bf16.msra.mxu1 %v1023_v5  ;;  %v1029_v14 = vld [vmem:[#allocation5 + $0xa0] sm:$0xff]  ;;  %v53_v21 = vld [vmem:[#allocation2 + $0x30] sm:$0xff]  ;;  %v1028_v22 = vld [vmem:[#allocation5 + $0x98] sm:$0xff]  ;;  %65 = vst [vmem:[#allocation1 + $0x1] ss:$4 sm:$0xff] %v49_v18 }
  0x14   :  { %645 = vmatpush.bf16.msra.mxu2 %v1031_v6  ;;  %v1037_v15 = vld [vmem:[#allocation5 + $0xe0] sm:$0xff]  ;;  %v1036_v23 = vld [vmem:[#allocation5 + $0xd8] sm:$0xff]  ;;  %69 = vst [vmem:[#allocation1 + $0x3] ss:$4 sm:$0xff] %v53_v21  ;;  %v1011_v24 = vld [vmem:[#allocation5 + $0x10] sm:$0xff] }
  0x15   :  { %658 = vmatpush.bf16.msra.mxu3 %v1039_v7  ;;  %v47_v17 = vld [vmem:[#allocation2] sm:$0xff]  ;;  %v1019_v25 = vld [vmem:[#allocation5 + $0x50] sm:$0xff]  ;;  %v48_v28 = vld [vmem:[#allocation2 + $0x8] sm:$0xff] }
  0x16   :  { %620 = vmatpush.bf16.msra.mxu0 %v1014_v8  ;;  %v51_v20 = vld [vmem:[#allocation2 + $0x20] sm:$0xff]  ;;  %63 = vst [vmem:[#allocation1] ss:$4 sm:$0xff] %v47_v17  ;;  %v1027_v26 = vld [vmem:[#allocation5 + $0x90] sm:$0xff]  ;;  %v50_v29 = vld [vmem:[#allocation2 + $0x18] sm:$0xff] }
  0x17   :  { %633 = vmatpush.bf16.msra.mxu1 %v1022_v9  ;;  %67 = vst [vmem:[#allocation1 + $0x2] ss:$4 sm:$0xff] %v51_v20  ;;  %v1035_v27 = vld [vmem:[#allocation5 + $0xd0] sm:$0xff]  ;;  %v1010_v30 = vld [vmem:[#allocation5 + $0x8] sm:$0xff]  ;;  %v1009_v35 = vld [vmem:[#allocation5] sm:$0xff] }
  0x18   :  { %646 = vmatpush.bf16.msra.mxu2 %v1030_v10  ;;  %v1018_v31 = vld [vmem:[#allocation5 + $0x48] sm:$0xff]  ;;  %71 = vst [vmem:[#allocation1 + $0x20] ss:$4 sm:$0xff] %v48_v28  ;;  %v54_v36 = vld [vmem:[#allocation2 + $0x38] sm:$0xff]  ;;  %v1017_v37 = vld [vmem:[#allocation5 + $0x40] sm:$0xff] }
  0x19   :  { %659 = vmatpush.bf16.msra.mxu3 %v1038_v11  ;;  %v1026_v32 = vld [vmem:[#allocation5 + $0x88] sm:$0xff]  ;;  %73 = vst [vmem:[#allocation1 + $0x21] ss:$4 sm:$0xff] %v50_v29  ;;  %v1025_v38 = vld [vmem:[#allocation5 + $0x80] sm:$0xff]  ;;  %v1048_v40 = vld [vmem:[#allocation5 + $0x138] sm:$0xff] }
  0x1a   :  { %621 = vmatpush.bf16.msra.mxu0 %v1013_v12  ;;  %v1034_v33 = vld [vmem:[#allocation5 + $0xc8] sm:$0xff]  ;;  %v1033_v39 = vld [vmem:[#allocation5 + $0xc0] sm:$0xff]  ;;  %v1056_v42 = vld [vmem:[#allocation5 + $0x178] sm:$0xff]  ;;  %77 = vst [vmem:[#allocation1 + $0x23] ss:$4 sm:$0xff] %v54_v36 }
  0x1b   :  { %634 = vmatpush.bf16.msra.mxu1 %v1021_v13  ;;  %v52_v34 = vld [vmem:[#allocation2 + $0x28] sm:$0xff]  ;;  %v1064_v46 = vld [vmem:[#allocation5 + $0x1b8] sm:$0xff]  ;;  %v1047_v52 = vld [vmem:[#allocation5 + $0x130] sm:$0xff] }
  0x1c   :  { %647 = vmatpush.bf16.msra.mxu2 %v1029_v14  ;;  %75 = vst [vmem:[#allocation1 + $0x22] ss:$4 sm:$0xff] %v52_v34  ;;  %v1072_v47 = vld [vmem:[#allocation5 + $0x1f8] sm:$0xff]  ;;  %v1055_v53 = vld [vmem:[#allocation5 + $0x170] sm:$0xff]  ;;  %v1046_v56 = vld [vmem:[#allocation5 + $0x128] sm:$0xff] }
  0x1d   :  { %660 = vmatpush.bf16.msra.mxu3 %v1037_v15  ;;  %v1063_v54 = vld [vmem:[#allocation5 + $0x1b0] sm:$0xff]  ;;  %v1054_v57 = vld [vmem:[#allocation5 + $0x168] sm:$0xff]  ;;  %v1045_v60 = vld [vmem:[#allocation5 + $0x120] sm:$0xff] }
  0x1e   :  { %622 = vmatpush.bf16.msra.mxu0 %v1012_v16  ;;  %v80_v41 = vld.sshfl [vmem:[#allocation1 + $0x10] sm:$0xff pattern:$0x73625140]  ;;  %v78_v43 = vld.sshfl [vmem:[#allocation1] sm:$0xff pattern:$0x73625140] }
  0x1f   :  { %635 = vmatpush.bf16.msra.mxu1 %v1020_v19  ;;  %v81_v44 = vld.sshfl [vmem:[#allocation1 + $0x18] sm:$0xff pattern:$0x73625140]  ;;  %v79_v45 = vld.sshfl [vmem:[#allocation1 + $0x8] sm:$0xff pattern:$0x73625140]  ;;  %v96_v48 = vpack.c.bf16 %v80_v41, %v80_v41  ;;  %v94_v49 = vpack.c.bf16 %v78_v43, %v78_v43 }
  0x20   :  { %648 = vmatpush.bf16.msra.mxu2 %v1028_v22  ;;  %v97_v50 = vpack.c.bf16 %v81_v44, %v81_v44  ;;  %v95_v51 = vpack.c.bf16 %v79_v45, %v79_v45  ;;  %v1071_v55 = vld [vmem:[#allocation5 + $0x1f0] sm:$0xff]  ;;  %v1062_v58 = vld [vmem:[#allocation5 + $0x1a8] sm:$0xff]  ;;  %v1053_v61 = vld [vmem:[#allocation5 + $0x160] sm:$0xff] }
  0x21   :  { %661 = vmatpush.bf16.msra.mxu3 %v1036_v23  ;;  %v1070_v59 = vld [vmem:[#allocation5 + $0x1e8] sm:$0xff]  ;;  %v1061_v62 = vld [vmem:[#allocation5 + $0x1a0] sm:$0xff]  ;;  %v1044_v0 = vld [vmem:[#allocation5 + $0x118] sm:$0xff] }
  0x22   :  { %623 = vmatpush.bf16.msra.mxu0 %v1011_v24  ;;  %v1069_v63 = vld [vmem:[#allocation5 + $0x1e0] sm:$0xff]  ;;  %v1052_v1 = vld [vmem:[#allocation5 + $0x158] sm:$0xff]  ;;  %v1043_v4 = vld [vmem:[#allocation5 + $0x110] sm:$0xff] }
  0x23   :  { %636 = vmatpush.bf16.msra.mxu1 %v1019_v25  ;;  %v1060_v2 = vld [vmem:[#allocation5 + $0x198] sm:$0xff]  ;;  %v1051_v5 = vld [vmem:[#allocation5 + $0x150] sm:$0xff]  ;;  %v1042_v8 = vld [vmem:[#allocation5 + $0x108] sm:$0xff] }
  0x24   :  { %649 = vmatpush.bf16.msra.mxu2 %v1027_v26  ;;  %v1068_v3 = vld [vmem:[#allocation5 + $0x1d8] sm:$0xff]  ;;  %v1059_v6 = vld [vmem:[#allocation5 + $0x190] sm:$0xff]  ;;  %v1050_v9 = vld [vmem:[#allocation5 + $0x148] sm:$0xff] }
  0x25   :  { %662 = vmatpush.bf16.msra.mxu3 %v1035_v27  ;;  %v1067_v7 = vld [vmem:[#allocation5 + $0x1d0] sm:$0xff]  ;;  %v1058_v10 = vld [vmem:[#allocation5 + $0x188] sm:$0xff]  ;;  %v1041_v12 = vld [vmem:[#allocation5 + $0x100] sm:$0xff] }
  0x26   :  { %624 = vmatpush.bf16.msra.mxu0 %v1010_v30  ;;  %v1066_v11 = vld [vmem:[#allocation5 + $0x1c8] sm:$0xff]  ;;  %v1049_v13 = vld [vmem:[#allocation5 + $0x140] sm:$0xff]  ;;  %v82_v16 = vld.sshfl [vmem:[#allocation1 + $0x20] sm:$0xff pattern:$0x73625140] }
  0x27   :  { %637 = vmatpush.bf16.msra.mxu1 %v1018_v31  ;;  %v1057_v14 = vld [vmem:[#allocation5 + $0x180] sm:$0xff]  ;;  %v84_v18 = vld.sshfl [vmem:[#allocation1 + $0x30] sm:$0xff pattern:$0x73625140]  ;;  %v98_v20 = vpack.c.bf16 %v82_v16, %v82_v16  ;;  %v1082_v30 = vld [vmem:[%s1208_s2] ss:$0 sm:$0xff] }
  0x28   :  { %650 = vmatpush.bf16.msra.mxu2 %v1026_v32  ;;  %v1065_v15 = vld [vmem:[#allocation5 + $0x1c0] sm:$0xff]  ;;  %v85_v19 = vld.sshfl [vmem:[#allocation1 + $0x38] sm:$0xff pattern:$0x73625140]  ;;  %v100_v22 = vpack.c.bf16 %v84_v18, %v84_v18 }
  0x29   :  { %663 = vmatpush.bf16.msra.mxu3 %v1034_v33  ;;  %v83_v17 = vld.sshfl [vmem:[#allocation1 + $0x28] sm:$0xff pattern:$0x73625140]  ;;  %v101_v23 = vpack.c.bf16 %v85_v19, %v85_v19 }
  0x2a   :  { %625 = vmatpush.bf16.msra.mxu0 %v1009_v35  ;;  %v99_v21 = vpack.c.bf16 %v83_v17, %v83_v17 }
  0x2b   :  { %638 = vmatpush.bf16.msra.mxu1 %v1017_v37 }
  0x2c   :  { %651 = vmatpush.bf16.msra.mxu2 %v1025_v38 }
  0x2d   :  { %664 = vmatpush.bf16.msra.mxu3 %v1033_v39  ;;  %626 = vmatmul.bf16.vlgmr.msra.gmra.mxu0 %v94_v49 }
  0x2e   :  { %670 = vmatpush.bf16.msrb.mxu0 %v1048_v40  ;;  %639 = vmatmul.bf16.vlgmr.msra.gmra.mxu1 %v95_v51 }
  0x2f   :  { %683 = vmatpush.bf16.msrb.mxu1 %v1056_v42  ;;  %652 = vmatmul.bf16.vlgmr.msra.gmra.mxu2 %v96_v48 }
  0x30   :  { %696 = vmatpush.bf16.msrb.mxu2 %v1064_v46  ;;  %665 = vmatmul.bf16.vlgmr.msra.gmra.mxu3 %v97_v50 }
  0x31   :  { %709 = vmatpush.bf16.msrb.mxu3 %v1072_v47 }
  0x32   :  { %671 = vmatpush.bf16.msrb.mxu0 %v1047_v52 }
  0x33   :  { %684 = vmatpush.bf16.msrb.mxu1 %v1055_v53 }
  0x34   :  { %697 = vmatpush.bf16.msrb.mxu2 %v1063_v54 }
  0x35   :  { %710 = vmatpush.bf16.msrb.mxu3 %v1071_v55 }
  0x36   :  { %672 = vmatpush.bf16.msrb.mxu0 %v1046_v56 }
  0x37   :  { %685 = vmatpush.bf16.msrb.mxu1 %v1054_v57 }
  0x38   :  { %698 = vmatpush.bf16.msrb.mxu2 %v1062_v58 }
  0x39   :  { %711 = vmatpush.bf16.msrb.mxu3 %v1070_v59 }
  0x3a   :  { %673 = vmatpush.bf16.msrb.mxu0 %v1045_v60 }
  0x3b   :  { %686 = vmatpush.bf16.msrb.mxu1 %v1053_v61 }
  0x3c   :  { %699 = vmatpush.bf16.msrb.mxu2 %v1061_v62 }
  0x3d   :  { %712 = vmatpush.bf16.msrb.mxu3 %v1069_v63 }
  0x3e   :  { %674 = vmatpush.bf16.msrb.mxu0 %v1044_v0 }
  0x3f   :  { %687 = vmatpush.bf16.msrb.mxu1 %v1052_v1 }
  0x40   :  { %700 = vmatpush.bf16.msrb.mxu2 %v1060_v2 }
  0x41   :  { %713 = vmatpush.bf16.msrb.mxu3 %v1068_v3 }
  0x42   :  { %675 = vmatpush.bf16.msrb.mxu0 %v1043_v4 }
  0x43   :  { %688 = vmatpush.bf16.msrb.mxu1 %v1051_v5 }
  0x44   :  { %701 = vmatpush.bf16.msrb.mxu2 %v1059_v6 }
  0x45   :  { %714 = vmatpush.bf16.msrb.mxu3 %v1067_v7 }
  0x46   :  { %676 = vmatpush.bf16.msrb.mxu0 %v1042_v8 }
  0x47   :  { %689 = vmatpush.bf16.msrb.mxu1 %v1050_v9 }
  0x48   :  { %702 = vmatpush.bf16.msrb.mxu2 %v1058_v10 }
  0x49   :  { %715 = vmatpush.bf16.msrb.mxu3 %v1066_v11 }
  0x4a   :  { %677 = vmatpush.bf16.msrb.mxu0 %v1041_v12 }
  0x4b   :  { %690 = vmatpush.bf16.msrb.mxu1 %v1049_v13 }
  0x4c   :  { %703 = vmatpush.bf16.msrb.mxu2 %v1057_v14 }
  0x4d   :  { %716 = vmatpush.bf16.msrb.mxu3 %v1065_v15  ;;  %678 = vmatmul.bf16.vlgmr.msrb.gmra.mxu0 %v98_v20 }
  0x4e   :  { %691 = vmatmul.bf16.vlgmr.msrb.gmra.mxu1 %v99_v21 }
  0x4f   :  { %704 = vmatmul.bf16.vlgmr.msrb.gmra.mxu2 %v100_v22 }
  0x50   :  { %717 = vmatmul.bf16.vlgmr.msrb.gmra.mxu3 %v101_v23 }
  0xaa   :  { %v627_v24 = vpop.f32.mrf.mxu0 }
  0xab   :  { %v640_v25 = vpop.f32.mrf.mxu1  ;;  %v628_v33 = vadd.f32 %v1082_v30, %v627_v24 }
  0xad   :  { %v641_v34 = vadd.f32 %v640_v25, %v628_v33 }
  0xb2   :  { %v653_v26 = vpop.f32.mrf.mxu2  ;;  %v629_v28 = vpop.f32.mrf.mxu0 }
  0xb3   :  { %v666_v27 = vpop.f32.mrf.mxu3  ;;  %v642_v29 = vpop.f32.mrf.mxu1  ;;  %v654_v35 = vadd.f32 %v653_v26, %v641_v34 }
  0xb5   :  { %v667_v36 = vadd.f32 %v666_v27, %v654_v35 }
  0xba   :  { %v655_v31 = vpop.f32.mrf.mxu2 }
  0xbb   :  { %v668_v32 = vpop.f32.mrf.mxu3 }
  0xca   :  { %v679_v37 = vpop.f32.mrf.mxu0 }
  0xcb   :  { %v692_v38 = vpop.f32.mrf.mxu1  ;;  %v680_v39 = vadd.f32 %v679_v37, %v667_v36 }
  0xcd   :  { %v693_v40 = vadd.f32 %v692_v38, %v680_v39 }
  0xd2   :  { %v705_v41 = vpop.f32.mrf.mxu2  ;;  %v681_v44 = vpop.f32.mrf.mxu0 }
  0xd3   :  { %v718_v42 = vpop.f32.mrf.mxu3  ;;  %v706_v43 = vadd.f32 %v705_v41, %v693_v40  ;;  %v694_v45 = vpop.f32.mrf.mxu1 }
  0xd5   :  { %v719_v46 = vadd.f32 %v718_v42, %v706_v43 }
  0xd7   :  { %722 = vmax.xlane.f32.xlu0 %v719_v46 }
  0xda   :  { %v707_v47 = vpop.f32.mrf.mxu2 }
  0xdb   :  { %v720_v48 = vpop.f32.mrf.mxu3 }
 0x14a   :  { %v723_v49 = vpop.xlane.xlu0 %722 }
 0x14b   :  { %v724_v50 = vsub.f32 %v719_v46, %v723_v49 }
 0x14d   :  { %v725_v51 = vmul.f32 1.442695, %v724_v50 }
 0x14f   :  { %1083 = vpow2.f32 %v725_v51 }
 0x155   :  { %v1084_v52 = vpop.eup %1083 }
 0x156   :  { %727 = vadd.xlane.f32.xlu0 %v1084_v52 }
 0x1c9   :  { %v728_v53 = vpop.xlane.xlu0 %727 }
 0x1ca   :  { %1085 = vlog2.f32 %v728_v53 }
 0x1d0   :  { %v1086_v54 = vpop.eup %1085 }
 0x1d1   :  { %v730_v55 = vmul.f32 0.6931472, %v1086_v54 }
 0x1d3   :  { %v731_v56 = vsub.f32 %v724_v50, %v730_v55 }
 0x1d5   :  { %732 = vst [vmem:[#allocation7] sm:$0xff] %v731_v56 }
 0x1d6   :  { %736 = vsyncadd [#allocation4], 96  ;;  %s739_s27 = sshll.u32 %s1209_s3, 4  ;;  %s1171_s28 = smov [#allocation7]   ;;  %s740_s27 = int_to_ptr.hbm [resolvable:$true] %s739_s27 }
 0x1d7   :  { %s737_s29 = sshll.u32 %s1171_s28, 4  ;;  %s1172_s30 = smov 32   ;;  %s738_s29 = int_to_ptr.vmem [resolvable:$true] %s737_s29 }
 0x1d8   :  { %s1173_s4 = smov 2  }
 0x1d9   :  { %745 = dma.vmem_to_hbm [thread:$0]  %s738_s29, 32, %s740_s27, [#allocation4], %s1172_s30, %s1172_s30, %s1173_s4  }
 0x1da   :  { %1163 = dma.done.wait [#allocation4], 128  }
 0x1db   :  { %1164 = vsyncadd [#allocation4], 4294967168 }
 0x1dc   :  { %750 = vsyncpa [#allocation3], 1 }
 0x1dd   :  { %751 = vsyncpa [#allocation6], 1 }
 0x1de   :  { %752 = vsyncpa [#allocation4], 1 }

</bundles_post_ra>
